<compile_context>
chip_gen: v7x
topology: tpu7x:2x2x1
jax: 0.10.0
libtpu: 0.0.40
codegen_flags: <defaults>
</compile_context>

<pallas_src>
import functools

import jax
import jax.numpy as jnp
from jax.experimental import pallas as pl
from jax.experimental.pallas import tpu as pltpu


def _attn_kernel(w_ref, x_ref, attn_ref, *, inv_hw, k_size):
    # w_ref    : SMEM (k_size,) f32          -- Conv1d weight, no bias
    # x_ref    : VMEM (1, C, HW_TILE)        -- one spatial tile of one sample
    # attn_ref : VMEM (1, C, 1) f32          -- resident accumulator / output
    h = pl.program_id(1)

    @pl.when(h == 0)
    def _():
        attn_ref[...] = jnp.zeros_like(attn_ref)

    # Partial spatial sum in f32; keepdims keeps C on the sublane axis so no
    # relayout round-trip is needed for the later broadcast.
    attn_ref[...] += jnp.sum(x_ref[...].astype(jnp.float32), axis=-1,
                             keepdims=True)

    @pl.when(h == pl.num_programs(1) - 1)
    def _():
        C = attn_ref.shape[1]
        m = attn_ref[...] * inv_hw                       # (1, C, 1) mean
        pad = (k_size - 1) // 2
        mp = jnp.pad(m, ((0, 0), (pad, pad), (0, 0)))    # zero-pad channels
        # Cross-correlation over channels: y[c] = sum_t w[t] * m[c - pad + t]
        y = w_ref[0] * mp[:, 0:C, :]
        for t in range(1, k_size):
            y = y + w_ref[t] * mp[:, t:t + C, :]
        attn_ref[...] = jax.nn.sigmoid(y)


def _scale_kernel(x_ref, attn_ref, o_ref):
    # x_ref    : VMEM (1, C, HW_TILE)   input dtype
    # attn_ref : VMEM (1, C, 1) f32
    # o_ref    : VMEM (1, C, HW_TILE)   input dtype (lane-dense store)
    attn = attn_ref[...].astype(x_ref.dtype)   # multiply in the input dtype
    o_ref[...] = x_ref[...] * attn


def _pick_hw_tile(hw_pad, c, itemsize, max_block_bytes=2 * 1024 * 1024,
                  hw_tile=None):
    """Largest multiple of 128 that divides hw_pad and keeps one block
    under ~max_block_bytes (so double-buffered in+out fits VMEM on v7x)."""
    if hw_tile is not None:
        assert hw_tile % 128 == 0 and hw_pad % hw_tile == 0
        return hw_tile
    cap = max(128, (max_block_bytes // (c * itemsize)) // 128 * 128)
    cap = min(cap, hw_pad)
    t = cap
    while t >= 128:
        if hw_pad % t == 0:
            return t
        t -= 128
    return 128  # hw_pad is a multiple of 128, so this always divides


def eca_forward(x, conv_weight, *, hw_tile=None):
    """x: (N, C, H, W); conv_weight: (1, 1, k_size) (odd k_size, no bias)."""
    N, C, H, W = x.shape
    HW = H * W
    k_size = int(conv_weight.shape[-1])
    w = conv_weight.reshape(-1).astype(jnp.float32)

    # Flatten spatial to the lane axis; pad to a multiple of 128 so every
    # store is unmasked (zero pad is harmless: sums unaffected, padded output
    # region is sliced off below).
    hw_pad = pl.cdiv(HW, 128) * 128
    x3 = x.reshape(N, C, HW)
    if hw_pad != HW:
        x3 = jnp.pad(x3, ((0, 0), (0, 0), (0, hw_pad - HW)))

    tile = _pick_hw_tile(hw_pad, C, jnp.dtype(x.dtype).itemsize,
                         hw_tile=hw_tile)
    n_hw = hw_pad // tile

    # ---- Phase 1: per-(N, C) attention weights (mean -> conv1d -> sigmoid).
    attn = pl.pallas_call(
        functools.partial(_attn_kernel, inv_hw=1.0 / HW, k_size=k_size),
        out_shape=jax.ShapeDtypeStruct((N, C, 1), jnp.float32),
        grid=(N, n_hw),
        in_specs=[
            pl.BlockSpec(memory_space=pltpu.SMEM),               # conv weights
            pl.BlockSpec((1, C, tile), lambda n, h: (n, 0, h)),  # x tile
        ],
        out_specs=pl.BlockSpec((1, C, 1), lambda n, h: (n, 0, 0)),
        compiler_params=pltpu.CompilerParams(
            dimension_semantics=("parallel", "arbitrary")),
    )(w, x3)

    # ---- Phase 2: tiled broadcast-multiply (fully parallel grid).
    out = pl.pallas_call(
        _scale_kernel,
        out_shape=jax.ShapeDtypeStruct((N, C, hw_pad), x.dtype),
        grid=(N, n_hw),
        in_specs=[
            pl.BlockSpec((1, C, tile), lambda n, h: (n, 0, h)),  # x tile
            pl.BlockSpec((1, C, 1), lambda n, h: (n, 0, 0)),     # attention
        ],
        out_specs=pl.BlockSpec((1, C, tile), lambda n, h: (n, 0, h)),
        compiler_params=pltpu.CompilerParams(
            dimension_semantics=("parallel", "parallel")),
    )(x3, attn)

    if hw_pad != HW:
        out = out[:, :, :HW]
    return out.reshape(N, C, H, W)


def _eca_reference(x, conv_weight):
    """Pure-JAX reference mirroring the PyTorch forward."""
    w = conv_weight.reshape(-1).astype(jnp.float32)
    k = w.shape[0]
    pad = (k - 1) // 2
    m = jnp.mean(x.astype(jnp.float32), axis=(2, 3))               # (N, C)
    C = m.shape[1]
    mp = jnp.pad(m, ((0, 0), (pad, pad)))
    y = sum(w[t] * mp[:, t:t + C] for t in range(k))
    attn = jax.nn.sigmoid(y)                                       # (N, C)
    return (x.astype(jnp.float32) * attn[:, :, None, None]).astype(x.dtype)


if __name__ == "__main__":
    key = jax.random.PRNGKey(0)
    kx, kw = jax.random.split(key)

    N, C, H, W = 2, 8, 16, 16
    k_size = 3

    x = jax.random.normal(kx, (N, C, H, W), dtype=jnp.float32)
    # Conv1d(1, 1, k_size, bias=False) weight: shape (1, 1, k_size)
    conv_weight = jax.random.normal(kw, (1, 1, k_size), dtype=jnp.float32) * 0.5

    # hw_tile=128 -> 2 spatial tiles per sample: exercises the tiled
    # accumulate/finalize path of phase 1 and the tiled multiply of phase 2.
    out = eca_forward(x, conv_weight, hw_tile=128)
    out = jax.block_until_ready(out)

    ref = _eca_reference(x, conv_weight)
    assert out.shape == x.shape and out.dtype == x.dtype
    assert jnp.allclose(out, ref, atol=1e-5, rtol=1e-5)

    print("KERNEL_OK")
</pallas_src>

<mosaic_0001>
module attributes {stable_mosaic.version = 11 : i64} {
  func.func @_attn_kernel(%arg0: i32, %arg1: i32, %arg2: memref<3xf32, #tpu.memory_space<smem>>, %arg3: memref<1x8x128xf32, #tpu.memory_space<vmem>>, %arg4: memref<1x8x1xf32, #tpu.memory_space<vmem>>) attributes {dimension_semantics = [#tpu.dimension_semantics<parallel>, #tpu.dimension_semantics<arbitrary>], iteration_bounds = array<i64: 2, 2>, scalar_prefetch = 0 : i64, scratch_operands = 0 : i64, tpu.core_type = #tpu.core_type<tc>, window_params = [{transform_indices = @transform_0, window_bounds = array<i64: 3>}, {transform_indices = @transform_1, window_bounds = array<i64: 1, 8, 128>}, {transform_indices = @transform_2, window_bounds = array<i64: 1, 8, 1>}]} {
    %c0_i32 = arith.constant 0 : i32
    %0 = arith.cmpi eq, %arg1, %c0_i32 : i32
    %1 = arith.extui %0 : i1 to i32
    %c0_i32_0 = arith.constant 0 : i32
    %2 = arith.cmpi ne, %1, %c0_i32_0 : i32
    scf.if %2 {
      %cst_10 = arith.constant 0.000000e+00 : f32
      %12 = vector.broadcast %cst_10 : f32 to vector<1x8x1xf32>
      %c0_11 = arith.constant 0 : index
      %c0_12 = arith.constant 0 : index
      %c0_13 = arith.constant 0 : index
      %13 = vector.load %arg4[%c0_11, %c0_12, %c0_13] : memref<1x8x1xf32, #tpu.memory_space<vmem>>, vector<1x8x1xf32>
      tpu.vector_store %arg4[%c0_11, %c0_12, %c0_13], %12 {strides = array<i32>} : memref<1x8x1xf32, #tpu.memory_space<vmem>>, vector<1x8x1xf32>,
    } else {
    }
    %c0 = arith.constant 0 : index
    %c0_1 = arith.constant 0 : index
    %c0_2 = arith.constant 0 : index
    %3 = vector.load %arg4[%c0, %c0_1, %c0_2] : memref<1x8x1xf32, #tpu.memory_space<vmem>>, vector<1x8x1xf32>
    %c0_3 = arith.constant 0 : index
    %c0_4 = arith.constant 0 : index
    %c0_5 = arith.constant 0 : index
    %4 = vector.load %arg3[%c0_3, %c0_4, %c0_5] : memref<1x8x128xf32, #tpu.memory_space<vmem>>, vector<1x8x128xf32>
    %cst = arith.constant dense<0.000000e+00> : vector<1x8xf32>
    %5 = vector.multi_reduction <add>, %4, %cst [2] : vector<1x8x128xf32> to vector<1x8xf32>
    %6 = vector.shape_cast %5 : vector<1x8xf32> to vector<1x8x1xf32>
    %7 = arith.addf %3, %6 : vector<1x8x1xf32>
    %c0_6 = arith.constant 0 : index
    %c0_7 = arith.constant 0 : index
    %c0_8 = arith.constant 0 : index
    %8 = vector.load %arg4[%c0_6, %c0_7, %c0_8] : memref<1x8x1xf32, #tpu.memory_space<vmem>>, vector<1x8x1xf32>
    tpu.vector_store %arg4[%c0_6, %c0_7, %c0_8], %7 {strides = array<i32>} : memref<1x8x1xf32, #tpu.memory_space<vmem>>, vector<1x8x1xf32>,
    %c1_i32 = arith.constant 1 : i32
    %9 = arith.cmpi eq, %arg1, %c1_i32 : i32
    %10 = arith.extui %9 : i1 to i32
    %c0_i32_9 = arith.constant 0 : i32
    %11 = arith.cmpi ne, %10, %c0_i32_9 : i32
    scf.if %11 {
      %c0_10 = arith.constant 0 : index
      %c0_11 = arith.constant 0 : index
      %c0_12 = arith.constant 0 : index
      %12 = vector.load %arg4[%c0_10, %c0_11, %c0_12] : memref<1x8x1xf32, #tpu.memory_space<vmem>>, vector<1x8x1xf32>
      %cst_13 = arith.constant 3.906250e-03 : f32
      %13 = vector.broadcast %cst_13 : f32 to vector<1x8x1xf32>
      %14 = arith.mulf %12, %13 : vector<1x8x1xf32>
      %c0_i32_14 = arith.constant 0 : i32
      %15 = arith.sitofp %c0_i32_14 : i32 to f32
      %16 = vector.broadcast %15 : f32 to vector<1x1x1xf32>
      %17 = tpu.concatenate %16, %14 in 1 : vector<1x1x1xf32>, vector<1x8x1xf32> -> vector<1x9x1xf32>
      %18 = vector.broadcast %15 : f32 to vector<1x1x1xf32>
      %19 = tpu.concatenate %17, %18 in 1 : vector<1x9x1xf32>, vector<1x1x1xf32> -> vector<1x10x1xf32>
      %c0_15 = arith.constant 0 : index
      %20 = memref.load %arg2[%c0_15] : memref<3xf32, #tpu.memory_space<smem>>
      %21 = vector.extract_strided_slice %19 {offsets = [0, 0, 0], sizes = [1, 8, 1], strides = [1, 1, 1]} : vector<1x10x1xf32> to vector<1x8x1xf32>
      %22 = vector.broadcast %20 : f32 to vector<1x8x1xf32>
      %23 = arith.mulf %22, %21 : vector<1x8x1xf32>
      %c1 = arith.constant 1 : index
      %24 = memref.load %arg2[%c1] : memref<3xf32, #tpu.memory_space<smem>>
      %25 = vector.extract_strided_slice %19 {offsets = [0, 1, 0], sizes = [1, 8, 1], strides = [1, 1, 1]} : vector<1x10x1xf32> to vector<1x8x1xf32>
      %26 = vector.broadcast %24 : f32 to vector<1x8x1xf32>
      %27 = arith.mulf %26, %25 : vector<1x8x1xf32>
      %28 = arith.addf %23, %27 : vector<1x8x1xf32>
      %c2 = arith.constant 2 : index
      %29 = memref.load %arg2[%c2] : memref<3xf32, #tpu.memory_space<smem>>
      %30 = vector.extract_strided_slice %19 {offsets = [0, 2, 0], sizes = [1, 8, 1], strides = [1, 1, 1]} : vector<1x10x1xf32> to vector<1x8x1xf32>
      %31 = vector.broadcast %29 : f32 to vector<1x8x1xf32>
      %32 = arith.mulf %31, %30 : vector<1x8x1xf32>
      %33 = arith.addf %28, %32 : vector<1x8x1xf32>
      %34 = arith.negf %33 : vector<1x8x1xf32>
      %35 = math.exp %34 : vector<1x8x1xf32>
      %cst_16 = arith.constant 1.000000e+00 : f32
      %36 = vector.broadcast %cst_16 : f32 to vector<1x8x1xf32>
      %37 = arith.addf %36, %35 : vector<1x8x1xf32>
      %38 = arith.divf %36, %37 : vector<1x8x1xf32>
      %c0_17 = arith.constant 0 : index
      %c0_18 = arith.constant 0 : index
      %c0_19 = arith.constant 0 : index
      %39 = vector.load %arg4[%c0_17, %c0_18, %c0_19] : memref<1x8x1xf32, #tpu.memory_space<vmem>>, vector<1x8x1xf32>
      tpu.vector_store %arg4[%c0_17, %c0_18, %c0_19], %38 {strides = array<i32>} : memref<1x8x1xf32, #tpu.memory_space<vmem>>, vector<1x8x1xf32>,
    } else {
    }
    return
  }
  func.func @transform_0(%arg0: i32, %arg1: i32) -> i32 {
    %c0_i32 = arith.constant 0 : i32
    %c0_i32_0 = arith.constant 0 : i32
    return %c0_i32 : i32
  }
  func.func @transform_1(%arg0: i32, %arg1: i32) -> (i32, i32, i32) {
    %c0_i32 = arith.constant 0 : i32
    %c0_i32_0 = arith.constant 0 : i32
    return %arg0, %c0_i32, %arg1 : i32, i32, i32
  }
  func.func @transform_2(%arg0: i32, %arg1: i32) -> (i32, i32, i32) {
    %c0_i32 = arith.constant 0 : i32
    %c0_i32_0 = arith.constant 0 : i32
    %c0_i32_1 = arith.constant 0 : i32
    return %arg0, %c0_i32, %c0_i32_0 : i32, i32, i32
  }
}

</mosaic_0001>

<bundles_post_ra>
// kernel: tpu_custom_call.1
= control target key start
LH: loop header
LB: loop body
LE: loop exit
PB: predicated region body
PF: predicated region fallthrough
CT: control target
= control target key end

     0   :  { %7 = vsyncpa [#allocation4], 0  ;;  %s764_s0 = inlined_call_operand.hbm [shape: f32[3], index: 0, kind: input, shape index: {}]   ;;  %s765_s1 = inlined_call_operand.hbm [shape: f32[2,8,256], index: 1, kind: input, shape index: {}]   ;;  %s766_s2 = inlined_call_operand.vmem [shape: f32[2,8,1], index: 2, kind: output, shape index: {}]  }
   0x1   :  { %8 = vsyncpa [#allocation3], 0 }
   0x2   :  { %10 = vsyncpa [#allocation3 + $0x1], 0  ;;  %s575_s9 = smov 0   ;;  %s577_s10 = smov 0  }
   0x3   :  { %s579_s11 = smov 0   ;;  %s581_s12 = smov 0  }
   0x4   :  { %s583_s13 = smov 0   ;;  %s585_s14 = smov 0  }
   0x5   :  { %s587_s15 = smov 0   ;;  %s589_s16 = smov 0  }
   0x6 LB: > { %s336_s17 = sadd.s32 4294967295, %s555_s16   ;;  %p71_p0 = scmp.ne.s32.totalorder %s531_s10, %s527_s9  ;;  %s555_s16 = sphi %s589_s16, %s16_s16   ;;  %s551_s15 = sphi %s587_s15, %s783_s15   ;;  %s547_s14 = sphi %s585_s14, %s782_s14   ;;  %s543_s13 = sphi %s583_s13, %s781_s13   ;;  %s539_s12 = sphi %s581_s12, %s780_s12   ;;  %s535_s11 = sphi %s579_s11, %s779_s11   ;;  %s531_s10 = sphi %s577_s10, %s778_s10   ;;  %s527_s9 = sphi %s575_s9, %s777_s9  }
   0x7   : > { %p615_p1 = scmp.eq.s32.totalorder %s336_s17, 0  ;;  %p338_p2 = scmp.ge.s32.totalorder %s555_s16, 1 }
   0x8   : > { %p108_p3 = scmp.lt.s32.totalorder %s555_s16, 5  ;;  %s25_s21 = sadd.s32 1, %s547_s14 }
   0x9   : > { %s770_s18 = scalar_select %p615_p1, 1, 0 }
   0xa   : > { %p623_p4 = por %p615_p1, %p71_p0  ;;  %p627_p5 = pnand %p338_p2, %p108_p3 }
   0xb   : > { %s28_s22 = sadd.s32 1, %s551_s15  ;;  %p26_p8 = scmp.ge.s32.totalorder %s25_s21, 2 }
   0xc   : > { %s771_s19 = scalar_select %p623_p4, 1, 0 }
   0xd   : > { %p361_p6 = pneg %p627_p5  ;;  %s442_s25 = scalar_lea.hbm %s764_s0, 16 }
   0xe   : > { %p443_p9 = scmp.ne.s32.totalorder %s764_s0, %s442_s25  ;;  %p449_p13 = scmp.lt.u32.totalorder %s442_s25, %s764_s0 }
   0xf   : > { %p362_p7 = pnand %p361_p6, %p615_p1 }
  0x11   : > { %p444_p10 = pneg %p362_p7 }
  0x13   : > { %p445_p11 = pnand %p444_p10, %p443_p9 }
  0x15   : > { %p446_p12 = pneg %p445_p11 }
  0x17   : > { %p451_p0 = pnand %p449_p13, %p446_p12 }
  0x19   : > { %454 = shalt.err (!%p451_p0)
}
  0x1a   : > { %s557_s30 = smov [#allocation2]   ;;  %s785_s21 = smov (%p26_p8, %s25_s21), 0 }
  0x1b   : > { %364 = dma.hbm_to_smem (!%p362_p7), %s764_s0, 16, %s557_s30, [#allocation4]  }
  0x1c   : > { %s787_s22 = smov (!%p26_p8, %s28_s22), %s551_s15  ;;  %s54_s5 = ssub.s32 %s547_s14, %s785_s21 }
  0x1d   : > { %s58_s6 = sadd.s32 1, %s535_s11  ;;  %p30_p2 = scmp.ge.s32.totalorder %s787_s22, 2 }
  0x1e   : > { %p65_p3 = scmp.ne.s32.totalorder %s535_s11, %s531_s10  ;;  %p66_p6 = scmp.eq.s32.totalorder %s555_s16, 0 }
  0x1f   : > { %p370_p9 = scmp.lt.s32.totalorder %s555_s16, 4  ;;  %s789_s22 = smov (%p30_p2, %s787_s22), 0 }
  0x20   : > { %p661_p10 = por %p66_p6, %p65_p3  ;;  %s130_s8 = sand.u32 1, %s535_s11  }
  0x21   : > { %s53_s9 = ssub.s32 %s551_s15, %s789_s22  ;;  %s341_s23 = sshll.u32 %s130_s8, 3 }
  0x22   : > { %s55_s17 = sor.u32 %s54_s5, %s53_s9  ;;  %s342_s24 = sshll.u32 %s551_s15, 1 }
  0x23   : > { %p56_p7 = scmp.eq.s32.totalorder %s55_s17, 0  ;;  %s134_s25 = scalar_lea.vmem [#allocation5], %s341_s23 }
  0x24   : > { %s143_s26 = sshll.u32 %s134_s25, 4  ;;  %s139_s28 = sadd.s32 %s547_s14, %s342_s24  ;;  %s673_s26 = int_to_ptr.vmem [resolvable:$true] %s143_s26 }
  0x25   : > { %s670_s27 = scalar_select %p56_p7, %s535_s11, %s58_s6  }
  0x26   : > { %s343_s29 = sshll.u32 %s139_s28, 7  ;;  %p679_p8 = pnand %p370_p9, %p661_p10 }
  0x27   : > { %s686_s5 = scalar_lea.hbm %s765_s1, %s343_s29  ;;  %s131_s6 = scalar_lea.sflag [#allocation3], %s130_s8 }
  0x28   : > { %s455_s9 = scalar_lea.hbm %s686_s5, 128  ;;  %p457_p12 = pneg %p679_p8 }
  0x29   : > { %p456_p11 = scmp.ne.s32.totalorder %s686_s5, %s455_s9  ;;  %s460_s23 = scalar_lea.hbm %s765_s1, 512 }
  0x2a   : > { %p461_p2 = scmp.lt.u32.totalorder %s686_s5, %s765_s1  ;;  %p462_p3 = scmp.lt.u32.totalorder %s460_s23, %s455_s9 }
  0x2b   : > { %p458_p13 = pnand %p457_p12, %p456_p11  ;;  %p464_p9 = scmp.lt.u32.totalorder %s455_s9, %s686_s5 }
  0x2c   : > { %p463_p6 = por %p462_p3, %p461_p2 }
  0x2d   : > { %p459_p0 = pneg %p458_p13 }
  0x2e   : > { %p465_p10 = por %p464_p9, %p463_p6 }
  0x30   : > { %p466_p7 = pnand %p465_p10, %p459_p0 }
  0x32   : > { %469 = shalt.err (!%p466_p7)
}
  0x33   : > { %s470_s8 = scalar_lea.vmem %s673_s26, 128  ;;  %s558_s28 = smov [#allocation5]  }
  0x34   : > { %p471_p11 = scmp.ne.s32.totalorder %s673_s26, %s470_s8  ;;  %s475_s29 = sshll.u32 %s558_s28, 4  ;;  %s476_s29 = int_to_ptr.vmem [resolvable:$false] %s475_s29 }
  0x35   : > { %s477_s3 = scalar_lea.vmem %s476_s29, 256  ;;  %p478_p1 = scmp.lt.s32.totalorder %s673_s26, %s476_s29 }
  0x36   : > { %p473_p13 = pnand %p471_p11, %p457_p12  ;;  %p479_p2 = scmp.lt.s32.totalorder %s477_s3, %s470_s8 }
  0x38   : > { %p474_p4 = pneg %p473_p13  ;;  %p480_p3 = por %p479_p2, %p478_p1 }
  0x3a   : > { %p481_p6 = pnand %p480_p3, %p474_p4 }
  0x3c   : > { %484 = shalt.err (!%p481_p6)
}
  0x3d   : > { %368 = dma.hbm_to_vmem [thread:$0]  (!%p679_p8), %s686_s5, 128, %s673_s26, %s131_s6  }
  0x3e   : > { %152 = sbr.rel (%p627_p5) target bundleno = 279 (0x117), region = 28  ;;  %p775_p12 = scmp.ne.s32.totalorder (!%p627_p5), %s770_s18, 0 }
  0x45   : > { %518 = dma.done.wait (%p775_p12), [#allocation4], 16  }
  0x46   : > { %520 = vsyncadd (%p775_p12), [#allocation4], 4294967280  ;;  %s158_s4 = sand.u32 1, %s531_s10   ;;  %p776_p1 = scmp.ne.s32.totalorder %s771_s19, 0 }
  0x47   : > { %s346_s9 = sshll.u32 %s158_s4, 3  ;;  %s159_s7 = scalar_lea.sflag [#allocation3], %s158_s4 }
  0x48   : > { %s162_s17 = scalar_lea.vmem [#allocation5], %s346_s9 }
  0x49   : > { %522 = dma.done.wait (%p776_p1), %s159_s7, 128  }
  0x4a   : > { %524 = vsyncadd (%p776_p1), %s159_s7, 4294967168 }
  0x4b   : > { %167 = sfence }
  0x4c   : > { %p183_p4 = scmp.lt.s32.totalorder %s543_s13, 1  ;;  %p348_p5 = scmp.ne.s32.totalorder %s539_s12, 0 }
  0x4d   : > { %vm191_vm0 = vcmask (!%p348_p5), 7168   ;;  %v559_v0 = vmov (!%p348_p5), 0.0  }
  0x4e   : > { %s791_s13 = smov (!%p183_p4, %s543_s13), 1  ;;  %190 = sbr.rel (%p348_p5) target bundleno = 85 (0x55), region = 40 }
  0x4f   : > { %s347_s20 = sshll.u32 %s791_s13, 3 }
  0x50   : > { %s729_s30 = scalar_lea.vmem %s766_s2, %s347_s20 }
  0x51   : > { %192 = vst.msk [vmem:[%s729_s30] sm:$0xff] (!%p348_p5), %vm191_vm0, %v559_v0 }
  0x55 PF: > { %v194_v1 = vld [vmem:[%s162_s17] sm:$0xff]  ;;  %vm198_vm1 = vcmask 7168   ;;  %p349_p8 = scmp.ne.s32.totalorder %s539_s12, 1 }
  0x56   : > { %195 = vadd.xlane.f32.xlu0 %v194_v1  ;;  %s212_s13 = sld [smem:[#allocation2]] (!%p349_p8)  ;;  %s350_s19 = sld [smem:[#allocation2 + $0x1]] (!%p349_p8)  ;;  %vm209_vm2 = vcmask (!%p349_p8), 1040384   ;;  %vm221_vm3 = vcmask (!%p349_p8), 1046528   ;;  %vm233_vm4 = vcmask (!%p349_p8), 1045504  }
  0x57   : > { %s351_s5 = sld [smem:[#allocation2 + $0x2]] (!%p349_p8) }
  0x58   : > { %v193_v2 = vld [vmem:[%s729_s30] sm:$0xff] }
  0x5c   : > { %v213_v10 = vstv (!%p349_p8), %s212_s13  ;;  %v216_v11 = vstv (!%p349_p8), %s350_s19 }
  0x5d   : > { %v228_v14 = vstv (!%p349_p8), %s351_s5 }
  0xe0   : > { %203 = sbr.rel (%p349_p8) target bundleno = 279 (0x117), region = 44 }
  0xe3   : > { %v196_v3 = vpop.xlane.xlu0 %195 }
  0xe4   : > { %v197_v4 = vadd.f32 %v196_v3, %v193_v2 }
  0xe6   : > { %199 = vst.msk [vmem:[%s729_s30] sm:$0xff] %vm198_vm1, %v197_v4 }
  0xed   : > { %v204_v5 = vld [vmem:[%s729_s30] sm:$0xff] }
  0xee   : > { %v205_v6 = vmul.f32 0.00390625, %v204_v5 }
  0xf0   : > { %v207_v7 = vrot.slane %v205_v6, 7 }
  0xf2   : > { %v210_v8 = vsel %vm209_vm2, 0.0, %v207_v7  ;;  %v211_v9 = vsel %vm209_vm2, %v207_v7, 0.0 }
  0xf3   : > { %v217_v12 = vmul.f32 %v216_v11, %v210_v8  ;;  %v218_v13 = vmul.f32 %v216_v11, %v211_v9  ;;  %v214_v15 = vmul.f32 %v213_v10, %v210_v8  ;;  %v229_v16 = vmul.f32 %v228_v14, %v210_v8 }
  0xf4   : > { %v230_v17 = vmul.f32 %v228_v14, %v211_v9 }
  0xf5   : > { %v222_v18 = vrot.slane %v217_v12, 1  ;;  %v223_v19 = vrot.slane %v218_v13, 1  ;;  %v234_v20 = vrot.slane %v229_v16, 2 }
  0xf6   : > { %v235_v21 = vrot.slane %v230_v17, 2 }
  0xf7   : > { %v224_v22 = vsel %vm221_vm3, %v222_v18, %v223_v19 }
  0xf8   : > { %v226_v23 = vadd.f32 %v224_v22, %v214_v15  ;;  %v236_v24 = vsel %vm233_vm4, %v234_v20, %v235_v21 }
  0xfa   : > { %v238_v25 = vadd.f32 %v236_v24, %v226_v23 }
  0xfc   : > { %v352_v26 = vmul.f32 -1.442695, %v238_v25 }
  0xfe   : > { %438 = vpow2.f32 %v352_v26 }
 0x108   : > { %v439_v27 = vpop.eup %438 }
 0x109   : > { %v242_v28 = vadd.f32 1.0, %v439_v27 }
 0x10b   : > { %440 = vrcp.f32 %v242_v28 }
 0x115   : > { %v441_v29 = vpop.eup %440 }
 0x116   : > { %245 = vst.msk [vmem:[%s729_s30] sm:$0xff] %vm198_vm1, %v441_v29 }
 0x117 PF: > { %s16_s16 = sadd.s32 1, %s555_s16   ;;  %s777_s9 = smov %s531_s10 }
 0x118   : > { %p13_p0 = scmp.ge.s32.totalorder %s16_s16, 6   ;;  %s778_s10 = smov %s535_s11 }
 0x119   : > { %s779_s11 = smov %s670_s27  ;;  %s780_s12 = smov %s547_s14 }
 0x11a   : > { %s781_s13 = smov %s551_s15  ;;  %s782_s14 = smov %s785_s21 }
 0x11b   : > { %s783_s15 = smov %s789_s22  ;;  %15 = sbr.rel (!%p13_p0) target bundleno = 6 (0x6), region = 81 }
 0x122   :  { %265 = vsyncpa [#allocation3], 1 }
 0x123   :  { %267 = vsyncpa [#allocation3 + $0x1], 1 }
 0x124   :  { %268 = vsyncpa [#allocation4], 1 }
 0x125   :  { %270 = vsyncpa [#allocation4 + $0x1], 1 }

</bundles_post_ra>
